<compile_context>
chip_gen: v7x
topology: tpu7x:2x2x1
jax: 0.10.0
libtpu: 0.0.40
codegen_flags: <defaults>
</compile_context>

<pallas_src>
import jax
import jax.numpy as jnp
from jax.experimental import pallas as pl
from jax.experimental.pallas import tpu as pltpu


def _se_block_kernel(x_ref, w1t_ref, w2t_ref, out_ref):
    """Fused SE block on a [BB, C, HW] activation slab.

    x_ref   : [BB, C, HW]  f32 activations (lane dim = HW)
    w1t_ref : [C, mid]     fc[0].weight transposed (resident in VMEM)
    w2t_ref : [mid, C]     fc[2].weight transposed (resident in VMEM)
    out_ref : [BB, C, HW]
    """
    x = x_ref[...]                                                      # [BB, C, HW]

    # Squeeze: global average pool over the spatial (lane) axis.
    s = jnp.mean(x, axis=-1)                                            # [BB, C]

    # Excite: FC1 -> ReLU -> FC2 -> sigmoid (tiny matmuls, f32 accumulate).
    h = jnp.dot(s, w1t_ref[...], preferred_element_type=jnp.float32)   # [BB, mid]
    h = jnp.maximum(h, 0.0)
    z = jnp.dot(h, w2t_ref[...], preferred_element_type=jnp.float32)   # [BB, C]
    y = 1.0 / (1.0 + jnp.exp(-z))                                       # [BB, C]

    # Scale: broadcast the per-(batch, channel) gate across spatial lanes.
    out_ref[...] = (x * y[:, :, None]).astype(out_ref.dtype)


def se_block_forward(x_nchw, w1, w2, *, vmem_budget_bytes=8 * 1024 * 1024):
    """SE_Block forward.  x is NCHW; w1=[mid,C], w2=[C,mid] (PyTorch layout)."""
    B, C, H, W = x_nchw.shape
    HW = H * W
    mid = w1.shape[0]
    assert w1.shape == (mid, C) and w2.shape == (C, mid), (w1.shape, w2.shape)

    out_dtype = x_nchw.dtype
    x = x_nchw.reshape(B, C, HW).astype(jnp.float32)
    w1t = jnp.transpose(w1).astype(jnp.float32)                         # [C, mid]
    w2t = jnp.transpose(w2).astype(jnp.float32)                         # [mid, C]

    # Batch elements per grid step: largest divisor of B whose in+out slab
    # (double-buffered) fits the VMEM budget.
    slab_bytes_per_batch = C * HW * 4 * 2 * 2                           # in+out, x2 buffers
    bb_max = max(1, vmem_budget_bytes // slab_bytes_per_batch)
    bb = 1
    for d in range(1, B + 1):
        if B % d == 0 and d <= bb_max:
            bb = d

    out = pl.pallas_call(
        _se_block_kernel,
        out_shape=jax.ShapeDtypeStruct((B, C, HW), out_dtype),
        grid=(B // bb,),
        in_specs=[
            pl.BlockSpec((bb, C, HW), lambda b: (b, 0, 0)),   # activation slab
            pl.BlockSpec((C, mid), lambda b: (0, 0)),         # fc1.weight^T (resident)
            pl.BlockSpec((mid, C), lambda b: (0, 0)),         # fc2.weight^T (resident)
        ],
        out_specs=pl.BlockSpec((bb, C, HW), lambda b: (b, 0, 0)),
        compiler_params=pltpu.CompilerParams(
            dimension_semantics=("parallel",)),               # megacore-shard batch
    )(x, w1t, w2t)

    return out.reshape(B, C, H, W)


# ----------------------------- reference (plain JAX, for verification) -------
def _reference_forward(x, w1, w2):
    y = jnp.mean(x, axis=(2, 3))                              # [B, C]
    y = jnp.maximum(y @ w1.T, 0.0)                            # [B, mid]
    y = 1.0 / (1.0 + jnp.exp(-(y @ w2.T)))                    # [B, C]
    return x * y[:, :, None, None]


if __name__ == "__main__":
    # ch_in must be >= reduction (=16); use a small but realistic SE shape.
    B, C, H, W = 2, 64, 16, 16
    reduction = 16
    mid = C // reduction                                      # 4

    key = jax.random.PRNGKey(0)
    kx, k1, k2 = jax.random.split(key, 3)

    x = jax.random.normal(kx, (B, C, H, W), dtype=jnp.float32)
    # nn.Linear weights: fc[0].weight is [mid, C], fc[2].weight is [C, mid].
    w1 = jax.random.normal(k1, (mid, C), dtype=jnp.float32) * 0.1
    w2 = jax.random.normal(k2, (C, mid), dtype=jnp.float32) * 0.1

    out = jax.block_until_ready(se_block_forward(x, w1, w2))
    ref = jax.block_until_ready(_reference_forward(x, w1, w2))

    assert out.shape == (B, C, H, W), out.shape
    assert jnp.allclose(out, ref, atol=1e-5, rtol=1e-5), (
        float(jnp.max(jnp.abs(out - ref))))
    print("KERNEL_OK")
</pallas_src>

<mosaic_0001>
module attributes {stable_mosaic.version = 11 : i64} {
  func.func @_se_block_kernel(%arg0: i32, %arg1: memref<2x64x256xf32, #tpu.memory_space<vmem>>, %arg2: memref<64x4xf32, #tpu.memory_space<vmem>>, %arg3: memref<4x64xf32, #tpu.memory_space<vmem>>, %arg4: memref<2x64x256xf32, #tpu.memory_space<vmem>>) attributes {dimension_semantics = [#tpu.dimension_semantics<parallel>], iteration_bounds = array<i64: 1>, scalar_prefetch = 0 : i64, scratch_operands = 0 : i64, tpu.core_type = #tpu.core_type<tc>, window_params = [{transform_indices = @transform_0, window_bounds = array<i64: 2, 64, 256>}, {pipeline_mode = #tpu.pipeline_mode<synchronous>, transform_indices = @transform_1, window_bounds = array<i64: 64, 4>}, {pipeline_mode = #tpu.pipeline_mode<synchronous>, transform_indices = @transform_2, window_bounds = array<i64: 4, 64>}, {transform_indices = @transform_3, window_bounds = array<i64: 2, 64, 256>}]} {
    %c0 = arith.constant 0 : index
    %c0_0 = arith.constant 0 : index
    %c0_1 = arith.constant 0 : index
    %0 = vector.load %arg1[%c0, %c0_0, %c0_1] : memref<2x64x256xf32, #tpu.memory_space<vmem>>, vector<2x64x256xf32>
    %cst = arith.constant dense<0.000000e+00> : vector<2x64xf32>
    %1 = vector.multi_reduction <add>, %0, %cst [2] : vector<2x64x256xf32> to vector<2x64xf32>
    %cst_2 = arith.constant 2.560000e+02 : f32
    %2 = vector.broadcast %cst_2 : f32 to vector<2x64xf32>
    %3 = arith.divf %1, %2 : vector<2x64xf32>
    %c0_3 = arith.constant 0 : index
    %c0_4 = arith.constant 0 : index
    %4 = vector.load %arg2[%c0_3, %c0_4] : memref<64x4xf32, #tpu.memory_space<vmem>>, vector<64x4xf32>
    %cst_5 = arith.constant dense<0.000000e+00> : vector<2x4xf32>
    %5 = tpu.matmul %3, %4, %cst_5 {dimension_numbers = #tpu.dot_dimension_numbers<[1], [0], [0], [1], [0, 0, 1, 1], [], []>} : vector<2x64xf32>, vector<64x4xf32>, vector<2x4xf32> -> vector<2x4xf32>
    %cst_6 = arith.constant 0.000000e+00 : f32
    %6 = vector.broadcast %cst_6 : f32 to vector<2x4xf32>
    %7 = arith.maximumf %5, %6 : vector<2x4xf32>
    %c0_7 = arith.constant 0 : index
    %c0_8 = arith.constant 0 : index
    %8 = vector.load %arg3[%c0_7, %c0_8] : memref<4x64xf32, #tpu.memory_space<vmem>>, vector<4x64xf32>
    %cst_9 = arith.constant dense<0.000000e+00> : vector<2x64xf32>
    %9 = tpu.matmul %7, %8, %cst_9 {dimension_numbers = #tpu.dot_dimension_numbers<[1], [0], [0], [1], [0, 0, 1, 1], [], []>} : vector<2x4xf32>, vector<4x64xf32>, vector<2x64xf32> -> vector<2x64xf32>
    %cst_10 = arith.constant 0.000000e+00 : f32
    %10 = vector.broadcast %cst_10 : f32 to vector<2x64xf32>
    %11 = arith.subf %10, %9 : vector<2x64xf32>
    %12 = math.exp %11 : vector<2x64xf32>
    %cst_11 = arith.constant 1.000000e+00 : f32
    %13 = vector.broadcast %cst_11 : f32 to vector<2x64xf32>
    %14 = arith.addf %13, %12 : vector<2x64xf32>
    %cst_12 = arith.constant 1.000000e+00 : f32
    %15 = vector.broadcast %cst_12 : f32 to vector<2x64xf32>
    %16 = arith.divf %15, %14 : vector<2x64xf32>
    %17 = vector.shape_cast %16 : vector<2x64xf32> to vector<2x64x1xf32>
    %18 = vector.broadcast %17 : vector<2x64x1xf32> to vector<2x64x256xf32>
    %19 = arith.mulf %0, %18 : vector<2x64x256xf32>
    %c0_13 = arith.constant 0 : index
    %c0_14 = arith.constant 0 : index
    %c0_15 = arith.constant 0 : index
    %20 = vector.load %arg4[%c0_13, %c0_14, %c0_15] : memref<2x64x256xf32, #tpu.memory_space<vmem>>, vector<2x64x256xf32>
    tpu.vector_store %arg4[%c0_13, %c0_14, %c0_15], %19 {strides = array<i32>} : memref<2x64x256xf32, #tpu.memory_space<vmem>>, vector<2x64x256xf32>,
    return
  }
  func.func @transform_0(%arg0: i32) -> (i32, i32, i32) {
    %c0_i32 = arith.constant 0 : i32
    %c0_i32_0 = arith.constant 0 : i32
    %c0_i32_1 = arith.constant 0 : i32
    return %arg0, %c0_i32, %c0_i32_0 : i32, i32, i32
  }
  func.func @transform_1(%arg0: i32) -> (i32, i32) {
    %c0_i32 = arith.constant 0 : i32
    %c0_i32_0 = arith.constant 0 : i32
    %c0_i32_1 = arith.constant 0 : i32
    return %c0_i32, %c0_i32_0 : i32, i32
  }
  func.func @transform_2(%arg0: i32) -> (i32, i32) {
    %c0_i32 = arith.constant 0 : i32
    %c0_i32_0 = arith.constant 0 : i32
    %c0_i32_1 = arith.constant 0 : i32
    return %c0_i32, %c0_i32_0 : i32, i32
  }
  func.func @transform_3(%arg0: i32) -> (i32, i32, i32) {
    %c0_i32 = arith.constant 0 : i32
    %c0_i32_0 = arith.constant 0 : i32
    %c0_i32_1 = arith.constant 0 : i32
    return %arg0, %c0_i32, %c0_i32_0 : i32, i32, i32
  }
}

</mosaic_0001>

<bundles_post_ra>
// kernel: tpu_custom_call.1
= control target key start
LH: loop header
LB: loop body
LE: loop exit
PB: predicated region body
PF: predicated region fallthrough
CT: control target
= control target key end

     0   :  { %8 = vsyncpa [#allocation3], 0  ;;  %s901_s0 = inlined_call_operand.hbm [shape: f32[2,64,256], index: 0, kind: input, shape index: {}]   ;;  %s902_s1 = inlined_call_operand.vmem [shape: f32[64,4], index: 1, kind: input, shape index: {}]   ;;  %s903_s2 = inlined_call_operand.vmem [shape: f32[4,64], index: 2, kind: input, shape index: {}]   ;;  %s904_s3 = inlined_call_operand.hbm [shape: f32[2,64,256], index: 3, kind: output, shape index: {}]  }
   0x1   :  { %9 = vsyncpa [#allocation4], 0  ;;  %s665_s12 = smov [#allocation2]   ;;  %s617_s16 = scalar_lea.hbm %s901_s0, 4096 }
   0x2   :  { %s15_s13 = sshll.u32 %s665_s12, 4  ;;  %p618_p0 = scmp.ne.s32.totalorder %s901_s0, %s617_s16  ;;  %s16_s13 = int_to_ptr.vmem [resolvable:$true] %s15_s13 }
   0x3   :  { %p621_p1 = scmp.lt.u32.totalorder %s617_s16, %s901_s0 }
   0x5   :  { %p623_p2 = pnand %p621_p1, %p618_p0 }
   0x7   :  { %626 = shalt.err (!%p623_p2)
}
   0x8   :  { %s627_s21 = scalar_lea.vmem %s16_s13, 4096  ;;  %p632_p4 = scmp.lt.s32.totalorder %s16_s13, %s16_s13 }
   0x9   :  { %p628_p3 = scmp.ne.s32.totalorder %s16_s13, %s627_s21  ;;  %p633_p5 = scmp.lt.s32.totalorder %s627_s21, %s627_s21 }
   0xb   :  { %p634_p6 = por %p633_p5, %p632_p4 }
   0xd   :  { %p635_p7 = pnand %p634_p6, %p628_p3 }
   0xf   :  { %638 = shalt.err (!%p635_p7)
}
  0x10   :  { %s666_s22 = smov 256   ;;  %s667_s23 = smov 16  }
  0x11   :  { %21 = dma.hbm_to_vmem [thread:$0]  %s901_s0, 4096, %s16_s13, [#allocation3], %s666_s22, %s666_s22, %s667_s23  }
  0x12   :  { %661 = dma.done.wait [#allocation3], 4096  }
  0x13   :  { %662 = vsyncadd [#allocation3], 4294963200  ;;  %v707_v0 = vld [vmem:[#allocation2 + $0x80] sm:$0xff]  ;;  %v709_v1 = vld [vmem:[#allocation2 + $0x88] sm:$0xff]  ;;  %v668_v51 = vmov 0.0|0.0   ;;  %vm669_vm0 = vmmov 0  }
  0x14   :  { %v711_v2 = vld [vmem:[#allocation2] sm:$0xff]  ;;  %v85_v3 = vadd.f32 %v709_v1, %v707_v0  ;;  %v715_v4 = vld [vmem:[#allocation2 + $0x8] sm:$0xff]  ;;  %v717_v5 = vld [vmem:[#allocation2 + $0x90] sm:$0xff]  ;;  %594 = vmatprep.subr.bf16.mxu0 %v668_v51  ;;  %v670_v61 = vmov 0.0   ;;  %vm161_vm1 = vcmask 130112   ;;  %vm168_vm2 = vcmask 195712  }
  0x15   :  { %v719_v6 = vld [vmem:[#allocation2 + $0x98] sm:$0xff]  ;;  %v61_v7 = vadd.f32 %v715_v4, %v711_v2  ;;  %v723_v8 = vld [vmem:[#allocation2 + $0x10] sm:$0xff]  ;;  %v731_v12 = vld [vmem:[#allocation2 + $0xa0] sm:$0xff]  ;;  %586 = vmatprep.mubr.msk.f32.mxu0 %vm669_vm0, %v670_v61  ;;  %589 = vmatprep.subr.mxu1 %v670_v61  ;;  %vm175_vm3 = vcmask 261312   ;;  %vm182_vm4 = vcmask 326912   ;;  %vm189_vm5 = vcmask 392512  }
  0x16   :  { %v725_v9 = vld [vmem:[#allocation2 + $0x18] sm:$0xff]  ;;  %86 = vadd.xlane.f32.xlu1 %v85_v3  ;;  %v88_v10 = vadd.f32 %v719_v6, %v717_v5  ;;  %v733_v13 = vld [vmem:[#allocation2 + $0xa8] sm:$0xff]  ;;  %v735_v14 = vld [vmem:[#allocation2 + $0x20] sm:$0xff]  ;;  %591 = vmatprep.mubr.msk.f32.mxu1 %vm669_vm0, %v670_v61  ;;  %vm196_vm6 = vcmask 458112   ;;  %vm203_vm7 = vcmask 523712   ;;  %vm244_vm8 = vcmask 1041409  }
  0x17   :  { %62 = vadd.xlane.f32.xlu0 %v61_v7  ;;  %v64_v11 = vadd.f32 %v725_v9, %v723_v8  ;;  %v737_v15 = vld [vmem:[#allocation2 + $0x28] sm:$0xff]  ;;  %v91_v16 = vadd.f32 %v733_v13, %v731_v12  ;;  %v743_v18 = vld [vmem:[#allocation2 + $0xb0] sm:$0xff]  ;;  %v745_v19 = vld [vmem:[#allocation2 + $0xb8] sm:$0xff]  ;;  %vm246_vm9 = vcmask 523264   ;;  %vm325_vm10 = vcmask 1043456  }
  0x18   :  { %v67_v17 = vadd.f32 %v737_v15, %v735_v14  ;;  %912 = vst [vmem:[#allocation8_spill] sm:$0xff] %v745_v19  ;;  %v747_v20 = vld [vmem:[#allocation2 + $0x30] sm:$0xff]  ;;  %v749_v21 = vld [vmem:[#allocation2 + $0x38] sm:$0xff]  ;;  %v94_v22 = vadd.f32 %v745_v19, %v743_v18  ;;  %v755_v24 = vld [vmem:[#allocation2 + $0xc0] sm:$0xff]  ;;  %vm321_vm11 = vcmask 31744  }
  0x19   :  { %v70_v23 = vadd.f32 %v749_v21, %v747_v20  ;;  %v757_v25 = vld [vmem:[#allocation2 + $0xc8] sm:$0xff]  ;;  %v759_v26 = vld [vmem:[#allocation2 + $0x40] sm:$0xff]  ;;  %v767_v30 = vld [vmem:[#allocation2 + $0xd0] sm:$0xff] }
  0x1a   :  { %89 = vadd.xlane.f32.xlu1 %v88_v10  ;;  %v761_v27 = vld [vmem:[#allocation2 + $0x48] sm:$0xff]  ;;  %v97_v28 = vadd.f32 %v757_v25, %v755_v24  ;;  %913 = vst [vmem:[#allocation9_spill] sm:$0xff] %v767_v30  ;;  %v769_v31 = vld [vmem:[#allocation2 + $0xd8] sm:$0xff]  ;;  %v771_v32 = vld [vmem:[#allocation2 + $0x50] sm:$0xff]  ;;  %v150_v10 = vlaneseq }
  0x1b   :  { %65 = vadd.xlane.f32.xlu0 %v64_v11  ;;  %v73_v29 = vadd.f32 %v761_v27, %v759_v26  ;;  %914 = vst [vmem:[#allocation10_spill] sm:$0xff] %v769_v31  ;;  %v773_v33 = vld [vmem:[#allocation2 + $0x58] sm:$0xff]  ;;  %v100_v34 = vadd.f32 %v769_v31, %v767_v30  ;;  %v779_v36 = vld [vmem:[#allocation2 + $0xe0] sm:$0xff]  ;;  %v781_v37 = vld [vmem:[#allocation2 + $0xe8] sm:$0xff] }
  0x1c   :  { %v76_v35 = vadd.f32 %v773_v33, %v771_v32  ;;  %915 = vst [vmem:[#allocation11_spill] sm:$0xff] %v779_v36  ;;  %916 = vst [vmem:[#allocation12_spill] sm:$0xff] %v781_v37  ;;  %v783_v38 = vld [vmem:[#allocation2 + $0x60] sm:$0xff]  ;;  %v785_v39 = vld [vmem:[#allocation2 + $0x68] sm:$0xff]  ;;  %v103_v40 = vadd.f32 %v781_v37, %v779_v36 }
  0x1d   :  { %v79_v41 = vadd.f32 %v785_v39, %v783_v38  ;;  %v791_v42 = vld [vmem:[#allocation2 + $0xf0] sm:$0xff]  ;;  %v793_v43 = vld [vmem:[#allocation2 + $0xf8] sm:$0xff]  ;;  %v126_v48 = vld [vmem:[%s902_s1] sm:$0xff] }
  0x1e   :  { %92 = vadd.xlane.f32.xlu1 %v91_v16  ;;  %917 = vst [vmem:[#allocation13_spill] sm:$0xff] %v791_v42  ;;  %918 = vst [vmem:[#allocation14_spill] sm:$0xff] %v793_v43  ;;  %v795_v44 = vld [vmem:[#allocation2 + $0x70] sm:$0xff]  ;;  %v797_v45 = vld [vmem:[#allocation2 + $0x78] sm:$0xff]  ;;  %v106_v46 = vadd.f32 %v793_v43, %v791_v42 }
  0x1f   :  { %68 = vadd.xlane.f32.xlu0 %v67_v17  ;;  %v82_v47 = vadd.f32 %v797_v45, %v795_v44  ;;  %v127_v49 = vld [vmem:[%s902_s1 + $0x8] sm:$0xff]  ;;  %v128_v52 = vld [vmem:[%s902_s1 + $0x10] sm:$0xff]  ;;  %v129_v53 = vld [vmem:[%s902_s1 + $0x18] sm:$0xff]  ;;  %v151_v17 = vand.u32 127, %v150_v10 }
  0x20   :  { %v595_v50 = vpack.c.bf16 %v127_v49, %v126_v48  ;;  %v598_v54 = vpack.c.bf16 %v129_v53, %v128_v52  ;;  %v130_v55 = vld [vmem:[%s902_s1 + $0x20] sm:$0xff]  ;;  %v131_v56 = vld [vmem:[%s902_s1 + $0x28] sm:$0xff]  ;;  %v132_v58 = vld [vmem:[%s902_s1 + $0x30] sm:$0xff] }
  0x21   :  { %v601_v57 = vpack.c.bf16 %v131_v56, %v130_v55  ;;  %v133_v59 = vld [vmem:[%s902_s1 + $0x38] sm:$0xff] }
  0x22   :  { %95 = vadd.xlane.f32.xlu1 %v94_v22  ;;  %596 = vmatpush3.bf16.msra.mxu0 %v595_v50  ;;  %v604_v60 = vpack.c.bf16 %v133_v59, %v132_v58 }
  0x23   :  { %71 = vadd.xlane.f32.xlu0 %v70_v23  ;;  %597 = vmatprep.subr.bf16.mxu0 %v668_v51  ;;  %v827_v23 = vshrl.u32 %v150_v10, 7 }
  0x26   :  { %98 = vadd.xlane.f32.xlu1 %v97_v28  ;;  %599 = vmatpush3.bf16.msra.mxu0 %v598_v54 }
  0x27   :  { %74 = vadd.xlane.f32.xlu0 %v73_v29  ;;  %600 = vmatprep.subr.bf16.mxu0 %v668_v51  ;;  %v156_v29 = vadd.s32 4294967288, %v151_v17 }
  0x29   :  { %v159_v49 = vsub.s32 %v156_v29, %v827_v23 }
  0x2a   :  { %101 = vadd.xlane.f32.xlu1 %v100_v34  ;;  %602 = vmatpush3.bf16.msra.mxu0 %v601_v57  ;;  %v163_v34 = vadd.s32 4294967280, %v151_v17 }
  0x2b   :  { %77 = vadd.xlane.f32.xlu0 %v76_v35  ;;  %603 = vmatprep.subr.bf16.mxu0 %v668_v51  ;;  %v170_v35 = vadd.s32 4294967272, %v151_v17  ;;  %v191_v51 = vadd.s32 4294967248, %v151_v17 }
  0x2c   :  { %v166_v50 = vsub.s32 %v163_v34, %v827_v23 }
  0x2d   :  { %v173_v53 = vsub.s32 %v170_v35, %v827_v23 }
  0x2e   :  { %104 = vadd.xlane.f32.xlu1 %v103_v40  ;;  %605 = vmatpush3.bf16.msra.mxu0 %v604_v60  ;;  %v177_v40 = vadd.s32 4294967264, %v151_v17 }
  0x2f   :  { %80 = vadd.xlane.f32.xlu0 %v79_v41 }
  0x30   :  { %v180_v54 = vsub.s32 %v177_v40, %v827_v23  ;;  %v198_v40 = vadd.s32 4294967240, %v151_v17 }
  0x32   :  { %107 = vadd.xlane.f32.xlu1 %v106_v46  ;;  %v184_v46 = vadd.s32 4294967256, %v151_v17 }
  0x33   :  { %83 = vadd.xlane.f32.xlu0 %v82_v47  ;;  %v154_v47 = vsub.s32 %v151_v17, %v827_v23  ;;  %v201_v17 = vsub.s32 %v198_v40, %v827_v23 }
  0x34   :  { %v187_v57 = vsub.s32 %v184_v46, %v827_v23 }
  0xa3   :  { %v87_v62 = vpop.xlane.xlu1 %86 }
  0xa4   :  { %v63_v63 = vpop.xlane.xlu0 %62  ;;  %v118_v59 = vmul.f32 0.00390625, %v87_v62 }
  0xa5   :  { %v110_v29 = vmul.f32 0.00390625, %v63_v63 }
  0xa6   :  { %v208_v37 = vrot.slane %v118_v59, %v154_v47 }
  0xa7   :  { %v90_v3 = vpop.xlane.xlu1 %89  ;;  %v155_v19 = vrot.slane %v110_v29, %v154_v47 }
  0xa8   :  { %v66_v7 = vpop.xlane.xlu0 %65  ;;  %v119_v52 = vmul.f32 0.00390625, %v90_v3  ;;  %v194_v3 = vsub.s32 %v191_v51, %v827_v23 }
  0xa9   :  { %v111_v55 = vmul.f32 0.00390625, %v66_v7 }
  0xaa   :  { %v212_v35 = vrot.slane %v119_v52, %v159_v49 }
  0xab   :  { %v93_v11 = vpop.xlane.xlu1 %92  ;;  %v160_v7 = vrot.slane %v111_v55, %v159_v49 }
  0xac   :  { %v69_v16 = vpop.xlane.xlu0 %68  ;;  %v120_v56 = vmul.f32 0.00390625, %v93_v11  ;;  %v213_v51 = vsel %vm161_vm1, %v212_v35, %v208_v37  ;;  %v320_v35 = vld [vmem:[%s903_s2] sm:$0xf]  ;;  %s671_s2 = smov [#allocation5]  }
  0xad   :  { %v112_v60 = vmul.f32 0.00390625, %v69_v16  ;;  %v162_v49 = vsel %vm161_vm1, %v160_v7, %v155_v19  ;;  %590 = vmatpush3.msk.msra.mxu1 %vm325_vm10, %v320_v35  ;;  %v923_v35 = vld [vmem:[#allocation10_spill] sm:$0xff]  ;;  %s544_s15 = sshll.u32 %s671_s2, 4  ;;  %s545_s15 = int_to_ptr.vmem [resolvable:$true] %s544_s15 }
  0xae   :  { %v217_v11 = vrot.slane %v120_v56, %v166_v50  ;;  %s639_s16 = scalar_lea.vmem %s545_s15, 4096  ;;  %p644_p9 = scmp.lt.s32.totalorder %s545_s15, %s545_s15 }
  0xaf   :  { %v96_v22 = vpop.xlane.xlu1 %95  ;;  %v167_v62 = vrot.slane %v112_v60, %v166_v50  ;;  %p640_p8 = scmp.ne.s32.totalorder %s545_s15, %s639_s16  ;;  %p645_p10 = scmp.lt.s32.totalorder %s639_s16, %s639_s16 }
  0xb0   :  { %v72_v28 = vpop.xlane.xlu0 %71  ;;  %v121_v61 = vmul.f32 0.00390625, %v96_v22  ;;  %v218_v55 = vsel %vm168_vm2, %v217_v11, %v213_v51 }
  0xb1   :  { %v113_v34 = vmul.f32 0.00390625, %v72_v28  ;;  %v169_v59 = vsel %vm168_vm2, %v167_v62, %v162_v49  ;;  %p646_p11 = por %p645_p10, %p644_p9 }
  0xb2   :  { %v222_v16 = vrot.slane %v121_v61, %v173_v53 }
  0xb3   :  { %v99_v41 = vpop.xlane.xlu1 %98  ;;  %v174_v63 = vrot.slane %v113_v34, %v173_v53  ;;  %p647_p12 = pnand %p646_p11, %p640_p8 }
  0xb4   :  { %v75_v48 = vpop.xlane.xlu0 %74  ;;  %v122_v43 = vmul.f32 0.00390625, %v99_v41  ;;  %v223_v47 = vsel %vm175_vm3, %v222_v16, %v218_v55 }
  0xb5   :  { %v114_v42 = vmul.f32 0.00390625, %v75_v48  ;;  %v176_v37 = vsel %vm175_vm3, %v174_v63, %v169_v59 }
  0xb6   :  { %v227_v28 = vrot.slane %v122_v43, %v180_v54 }
  0xb7   :  { %v102_v58 = vpop.xlane.xlu1 %101  ;;  %v181_v52 = vrot.slane %v114_v42, %v180_v54 }
  0xb8   :  { %v78_v10 = vpop.xlane.xlu0 %77  ;;  %v123_v31 = vmul.f32 0.00390625, %v102_v58 }
  0xb9   :  { %v115_v30 = vmul.f32 0.00390625, %v78_v10  ;;  %v183_v19 = vsel %vm182_vm4, %v181_v52, %v176_v37 }
  0xba   :  { %v232_v48 = vrot.slane %v123_v31, %v187_v57  ;;  %v228_v31 = vsel %vm182_vm4, %v227_v28, %v223_v47 }
  0xbb   :  { %v105_v46 = vpop.xlane.xlu1 %104  ;;  %v188_v56 = vrot.slane %v115_v30, %v187_v57 }
  0xbc   :  { %v124_v22 = vmul.f32 0.00390625, %v105_v46  ;;  %v81_v36 = vpop.xlane.xlu0 %80  ;;  %v233_v54 = vsel %vm189_vm5, %v232_v48, %v228_v31  ;;  %v442_v48 = vsub.s32 1, %v827_v23 }
  0xbd   :  { %v116_v41 = vmul.f32 0.00390625, %v81_v36  ;;  %v190_v57 = vsel %vm189_vm5, %v188_v56, %v183_v19 }
  0xbe   :  { %v237_v58 = vrot.slane %v124_v22, %v194_v3 }
  0xbf   :  { %v108_v50 = vpop.xlane.xlu1 %107  ;;  %v195_v53 = vrot.slane %v116_v41, %v194_v3  ;;  %v407_v41 = vsub.s32 0, %v827_v23 }
  0xc0   :  { %v125_v43 = vmul.f32 0.00390625, %v108_v50  ;;  %v84_v36 = vpop.xlane.xlu0 %83  ;;  %v238_v60 = vsel %vm196_vm6, %v237_v58, %v233_v54 }
  0xc1   :  { %v117_v42 = vmul.f32 0.00390625, %v84_v36  ;;  %v197_v10 = vsel %vm196_vm6, %v195_v53, %v190_v57 }
  0xc2   :  { %v242_v30 = vrot.slane %v125_v43, %v201_v17 }
  0xc3   :  { %v202_v61 = vrot.slane %v117_v42, %v201_v17 }
  0xc4   :  { %v243_v29 = vsel %vm203_vm7, %v242_v30, %v238_v60 }
  0xc5   :  { %v204_v34 = vsel %vm203_vm7, %v202_v61, %v197_v10  ;;  %v919_v61 = vld [vmem:[#allocation8_spill] sm:$0xff] }
  0xc6   :  { %v245_v3 = vsel %vm244_vm8, %v243_v29, %v204_v34  ;;  %v920_v29 = vld [vmem:[#allocation11_spill] sm:$0xff] }
  0xc7   :  { %587 = vmatmul.mubr.msk.f32.vlgmr.msra.gmra.mrb[0].mxu0 %vm246_vm9, %v245_v3  ;;  %v921_v3 = vld [vmem:[#allocation12_spill] sm:$0xff] }
 0x19a   :  { %v315_v40 = vpop.f32.mrb[0].mxu0 }
 0x19b   :  { %v319_v7 = vmax.f32 %v315_v40, 0.0  ;;  %v588_v11 = vpop.f32.mrb[1].mxu0 }
 0x19d   :  { %592 = vmatmul.mubr.msk.f32.vlgmr.msra.gmra.mrb[0].mxu1 %vm321_vm11, %v319_v7  ;;  %v924_v7 = vld [vmem:[#allocation13_spill] sm:$0xff] }
 0x270   :  { %v395_v46 = vpop.f32.mrb[0].mxu1 }
 0x271   :  { %v399_v62 = vsub.f32 0.0, %v395_v46  ;;  %v593_v16 = vpop.f32.mrb[1].mxu1  ;;  %v925_v46 = vld [vmem:[#allocation14_spill] sm:$0xff] }
 0x273   :  { %v400_v22 = vmul.f32 1.442695, %v399_v62 }
 0x275   :  { %613 = vpow2.f32 %v400_v22 }
 0x27f   :  { %v614_v63 = vpop.eup %613 }
 0x280   :  { %v402_v28 = vadd.f32 1.0, %v614_v63 }
 0x282   :  { %615 = vrcp.f32 %v402_v28 }
 0x28c   :  { %v616_v51 = vpop.eup %615 }
 0x28d   :  { %v408_v52 = vrot.slane %v616_v51, %v407_v41  ;;  %v443_v17 = vrot.slane %v616_v51, %v442_v48 }
 0x28f   :  { %414 = vbcast.lane.b32.xlu1 %v408_v52, 264  ;;  %410 = vbcast.lane.b32.xlu0 %v408_v52, 256 }
 0x293   :  { %418 = vbcast.lane.b32.xlu1 %v408_v52, 272  ;;  %426 = vbcast.lane.b32.xlu0 %v408_v52, 288 }
 0x297   :  { %422 = vbcast.lane.b32.xlu1 %v408_v52, 280  ;;  %434 = vbcast.lane.b32.xlu0 %v408_v52, 304 }
 0x29b   :  { %430 = vbcast.lane.b32.xlu1 %v408_v52, 296  ;;  %445 = vbcast.lane.b32.xlu0 %v443_v17, 256 }
 0x29f   :  { %438 = vbcast.lane.b32.xlu1 %v408_v52, 312  ;;  %453 = vbcast.lane.b32.xlu0 %v443_v17, 272 }
 0x2a3   :  { %449 = vbcast.lane.b32.xlu1 %v443_v17, 264  ;;  %461 = vbcast.lane.b32.xlu0 %v443_v17, 288 }
 0x2a7   :  { %457 = vbcast.lane.b32.xlu1 %v443_v17, 280  ;;  %469 = vbcast.lane.b32.xlu0 %v443_v17, 304 }
 0x2ab   :  { %465 = vbcast.lane.b32.xlu1 %v443_v17, 296 }
 0x2af   :  { %473 = vbcast.lane.b32.xlu1 %v443_v17, 312 }
 0x301   :  { %v415_v49 = vpop.permute.xlu1 %414  ;;  %v411_v55 = vpop.permute.xlu0 %410 }
 0x302   :  { %v477_v56 = vmul.f32 %v415_v49, %v723_v8  ;;  %v478_v58 = vmul.f32 %v415_v49, %v725_v9  ;;  %v475_v23 = vmul.f32 %v411_v55, %v711_v2  ;;  %v476_v50 = vmul.f32 %v411_v55, %v715_v4 }
 0x304   :  { %509 = vst [vmem:[#allocation5 + $0x10] sm:$0xff] %v477_v56  ;;  %510 = vst [vmem:[#allocation5 + $0x18] sm:$0xff] %v478_v58 }
 0x305   :  { %507 = vst [vmem:[#allocation5] sm:$0xff] %v475_v23  ;;  %508 = vst [vmem:[#allocation5 + $0x8] sm:$0xff] %v476_v50  ;;  %v419_v59 = vpop.permute.xlu1 %418  ;;  %v427_v47 = vpop.permute.xlu0 %426 }
 0x306   :  { %v479_v53 = vmul.f32 %v419_v59, %v735_v14  ;;  %v480_v43 = vmul.f32 %v419_v59, %v737_v15  ;;  %v483_v36 = vmul.f32 %v427_v47, %v759_v26  ;;  %v484_v8 = vmul.f32 %v427_v47, %v761_v27 }
 0x308   :  { %511 = vst [vmem:[#allocation5 + $0x20] sm:$0xff] %v479_v53  ;;  %512 = vst [vmem:[#allocation5 + $0x28] sm:$0xff] %v480_v43 }
 0x309   :  { %515 = vst [vmem:[#allocation5 + $0x40] sm:$0xff] %v483_v36  ;;  %516 = vst [vmem:[#allocation5 + $0x48] sm:$0xff] %v484_v8  ;;  %v423_v2 = vpop.permute.xlu1 %422  ;;  %v435_v4 = vpop.permute.xlu0 %434 }
 0x30a   :  { %v481_v9 = vmul.f32 %v423_v2, %v747_v20  ;;  %v482_v37 = vmul.f32 %v423_v2, %v749_v21  ;;  %v487_v31 = vmul.f32 %v435_v4, %v783_v38  ;;  %v488_v14 = vmul.f32 %v435_v4, %v785_v39 }
 0x30c   :  { %513 = vst [vmem:[#allocation5 + $0x30] sm:$0xff] %v481_v9  ;;  %514 = vst [vmem:[#allocation5 + $0x38] sm:$0xff] %v482_v37 }
 0x30d   :  { %519 = vst [vmem:[#allocation5 + $0x60] sm:$0xff] %v487_v31  ;;  %520 = vst [vmem:[#allocation5 + $0x68] sm:$0xff] %v488_v14  ;;  %v431_v15 = vpop.permute.xlu1 %430  ;;  %v446_v26 = vpop.permute.xlu0 %445 }
 0x30e   :  { %v485_v27 = vmul.f32 %v431_v15, %v771_v32  ;;  %v486_v42 = vmul.f32 %v431_v15, %v773_v33  ;;  %v491_v19 = vmul.f32 %v446_v26, %v707_v0  ;;  %v492_v20 = vmul.f32 %v446_v26, %v709_v1 }
 0x310   :  { %517 = vst [vmem:[#allocation5 + $0x50] sm:$0xff] %v485_v27  ;;  %518 = vst [vmem:[#allocation5 + $0x58] sm:$0xff] %v486_v42 }
 0x311   :  { %523 = vst [vmem:[#allocation5 + $0x80] sm:$0xff] %v491_v19  ;;  %524 = vst [vmem:[#allocation5 + $0x88] sm:$0xff] %v492_v20  ;;  %v439_v21 = vpop.permute.xlu1 %438  ;;  %v454_v38 = vpop.permute.xlu0 %453 }
 0x312   :  { %v489_v39 = vmul.f32 %v439_v21, %v795_v44  ;;  %v490_v54 = vmul.f32 %v439_v21, %v797_v45  ;;  %v495_v30 = vmul.f32 %v454_v38, %v731_v12  ;;  %v496_v32 = vmul.f32 %v454_v38, %v733_v13 }
 0x314   :  { %521 = vst [vmem:[#allocation5 + $0x70] sm:$0xff] %v489_v39  ;;  %522 = vst [vmem:[#allocation5 + $0x78] sm:$0xff] %v490_v54 }
 0x315   :  { %527 = vst [vmem:[#allocation5 + $0xa0] sm:$0xff] %v495_v30  ;;  %528 = vst [vmem:[#allocation5 + $0xa8] sm:$0xff] %v496_v32  ;;  %v450_v0 = vpop.permute.xlu1 %449  ;;  %v462_v1 = vpop.permute.xlu0 %461 }
 0x316   :  { %v493_v33 = vmul.f32 %v450_v0, %v717_v5  ;;  %v494_v57 = vmul.f32 %v450_v0, %v719_v6  ;;  %v499_v60 = vmul.f32 %v462_v1, %v755_v24  ;;  %v500_v44 = vmul.f32 %v462_v1, %v757_v25  ;;  %v922_v24 = vld [vmem:[#allocation9_spill] sm:$0xff] }
 0x318   :  { %525 = vst [vmem:[#allocation5 + $0x90] sm:$0xff] %v493_v33  ;;  %526 = vst [vmem:[#allocation5 + $0x98] sm:$0xff] %v494_v57 }
 0x319   :  { %531 = vst [vmem:[#allocation5 + $0xc0] sm:$0xff] %v499_v60  ;;  %532 = vst [vmem:[#allocation5 + $0xc8] sm:$0xff] %v500_v44  ;;  %v458_v12 = vpop.permute.xlu1 %457  ;;  %v470_v13 = vpop.permute.xlu0 %469 }
 0x31a   :  { %v497_v45 = vmul.f32 %v458_v12, %v743_v18  ;;  %v498_v10 = vmul.f32 %v458_v12, %v919_v61  ;;  %v503_v34 = vmul.f32 %v470_v13, %v920_v29  ;;  %v504_v5 = vmul.f32 %v470_v13, %v921_v3 }
 0x31c   :  { %529 = vst [vmem:[#allocation5 + $0xb0] sm:$0xff] %v497_v45  ;;  %530 = vst [vmem:[#allocation5 + $0xb8] sm:$0xff] %v498_v10 }
 0x31d   :  { %535 = vst [vmem:[#allocation5 + $0xe0] sm:$0xff] %v503_v34  ;;  %536 = vst [vmem:[#allocation5 + $0xe8] sm:$0xff] %v504_v5  ;;  %v466_v6 = vpop.permute.xlu1 %465 }
 0x31e   :  { %v501_v25 = vmul.f32 %v466_v6, %v922_v24  ;;  %v502_v40 = vmul.f32 %v466_v6, %v923_v35 }
 0x320   :  { %533 = vst [vmem:[#allocation5 + $0xd0] sm:$0xff] %v501_v25  ;;  %534 = vst [vmem:[#allocation5 + $0xd8] sm:$0xff] %v502_v40 }
 0x321   :  { %v474_v18 = vpop.permute.xlu1 %473 }
 0x322   :  { %v505_v11 = vmul.f32 %v474_v18, %v924_v7  ;;  %v506_v62 = vmul.f32 %v474_v18, %v925_v46 }
 0x324   :  { %537 = vst [vmem:[#allocation5 + $0xf0] sm:$0xff] %v505_v11  ;;  %538 = vst [vmem:[#allocation5 + $0xf8] sm:$0xff] %v506_v62 }
 0x325   :  { %650 = shalt.err (!%p647_p12)
}
 0x326   :  { %s651_s19 = scalar_lea.hbm %s904_s3, 4096 }
 0x327   :  { %p652_p13 = scmp.ne.s32.totalorder %s904_s3, %s651_s19  ;;  %p655_p0 = scmp.lt.u32.totalorder %s651_s19, %s904_s3 }
 0x329   :  { %p657_p1 = pnand %p655_p0, %p652_p13 }
 0x32b   :  { %660 = shalt.err (!%p657_p1)
}
 0x32c   :  { %550 = dma.vmem_to_hbm [thread:$0]  %s545_s15, 4096, %s904_s3, [#allocation4], %s666_s22, %s666_s22, %s667_s23  }
 0x32d   :  { %663 = dma.done.wait [#allocation4], 4096  }
 0x32e   :  { %664 = vsyncadd [#allocation4], 4294963200 }
 0x32f   :  { %554 = vsyncpa [#allocation3], 1 }
 0x330   :  { %555 = vsyncpa [#allocation4], 1 }

</bundles_post_ra>
